<compile_context>
chip_gen: v7x
topology: tpu7x:2x2x1
jax: 0.10.0
libtpu: 0.0.40
codegen_flags: <defaults>
</compile_context>

<pallas_src>
import functools
import math

import jax
import jax.numpy as jnp
import numpy as np
from jax.experimental import pallas as pl
from jax.experimental.pallas import tpu as pltpu


# --------------------------------------------------------------------------
# Fused kernel: mask-gated noise concat + modulated 3x3 conv + ToMask head
# --------------------------------------------------------------------------
def _fused_kernel(nw_ref, inp_ref, noise_ref, mask_ref, style_ref,
                  modw_ref, modb_ref, wflat_ref, w2_ref,
                  drv_ref, mout_ref, *, W, K):
    f32 = jnp.float32
    Bc, Cr, HW = inp_ref.shape
    Cin = 2 * Cr
    Cout = wflat_ref.shape[0]
    R = K // 2

    nw = nw_ref[0, 0]                                            # SMEM scalar

    # ---- hoisted border-validity masks (shared by all taps & batch items) ----
    flat = jax.lax.broadcasted_iota(jnp.int32, (1, HW), 1)
    col = flat % W
    x_mask = {0: None}
    y_mask = {0: None}
    for d in range(1, R + 1):
        x_mask[-d] = col >= d                    # valid lanes for dx = -d
        x_mask[d] = col < (W - d)                # valid lanes for dx = +d
        y_mask[-d] = flat >= d * W               # valid lanes for dy = -d
        y_mask[d] = flat < (HW - d * W)          # valid lanes for dy = +d

    # ---- style modulation for all Bc items in one small MXU matmul ----
    s_all = style_ref[...][:, 0, :]                              # (Bc, Sd)
    s_flat = jnp.dot(s_all, modw_ref[...],
                     preferred_element_type=f32) + modb_ref[...]  # (Bc, KK*Cin)

    wflat = wflat_ref[...]                                       # (Cout, KK*Cin)
    w2 = w2_ref[...]                                             # (1, Cout)

    for b in range(Bc):                                          # Bc is tiny (static unroll)
        m = mask_ref[b]                                          # (1, HW)

        # (1) masked noise injection + channel concat -- stays in VMEM
        xcat = jnp.concatenate(
            [m * inp_ref[b], (nw * (1.0 - m)) * noise_ref[b]], axis=0)   # (Cin, HW)

        # (2a) modulate + demodulate the flat (Cout, KK*Cin) weight, then fuse
        # the ToMask 1x1 head as an extra LHS row -> (Cout+1, KK*Cin)
        w = wflat * s_flat[b:b + 1, :]
        w = w * jax.lax.rsqrt(jnp.sum(w * w, axis=1, keepdims=True) + 1e-8)
        w2row = jnp.dot(w2, w, preferred_element_type=f32)        # (1, KK*Cin)
        w_all = jnp.concatenate([w, w2row], axis=0)               # (Cout+1, KK*Cin)

        # (2b) im2col via XLU lane rotations + hoisted border masks.
        # rolled[i] = xcat[(i + dy*W + dx) mod HW]; wrap-around is zeroed by masks.
        taps = []
        for ky in range(K):
            for kx in range(K):
                dy, dx = ky - R, kx - R
                off = dy * W + dx
                t = pltpu.roll(xcat, shift=(-off) % HW, axis=1) if off else xcat
                my, mx = y_mask[dy], x_mask[dx]
                if my is None:
                    valid = mx
                elif mx is None:
                    valid = my
                else:
                    valid = jnp.logical_and(my, mx)
                if valid is not None:
                    t = jnp.where(valid, t, 0.0)
                taps.append(t)
        patches = jnp.concatenate(taps, axis=0)                   # (KK*Cin, HW)

        # (2c)+(3): 3x3 conv AND ToMask head as one bf16 MXU contraction
        out = jnp.dot(w_all.astype(jnp.bfloat16),
                      patches.astype(jnp.bfloat16),
                      preferred_element_type=f32)                  # (Cout+1, HW)
        drv_ref[b] = out[:Cout]
        mout_ref[b] = out[Cout:Cout + 1] + m


def masked_styled_conv_forward(inp, style, mask, noise, params, K, *, num_chunks=1):
    """num_chunks=1: whole batch per grid step (v5e/v6e, single TensorCore).
       num_chunks=2: one batch chunk per TensorCore (v7x megacore)."""
    B, Cr, H, W = inp.shape
    HW = H * W
    Cin = 2 * Cr
    KK = K * K
    Sd = style.shape[-1]
    Cout = params["w_flat_s"].shape[0]

    # Assumptions the kernel relies on (per review):
    assert noise.shape == inp.shape
    assert mask.shape == (B, 1, H, W), \
        "ToMask upsample/blur branch not implemented (mask must match input res)"
    assert B % num_chunks == 0
    Bc = B // num_chunks
    # Full H*W in one block; patches buffer (KK*Cin, HW) f32 must fit VMEM.
    assert KK * Cin * HW * 4 <= 8 * 1024 * 1024, \
        "add spatial (HW) tiling before scaling resolution"

    kernel = functools.partial(_fused_kernel, W=W, K=K)
    drv, mout = pl.pallas_call(
        kernel,
        out_shape=(jax.ShapeDtypeStruct((B, Cout, HW), jnp.float32),
                   jax.ShapeDtypeStruct((B, 1, HW), jnp.float32)),
        grid=(num_chunks,),
        in_specs=[
            pl.BlockSpec(memory_space=pltpu.MemorySpace.SMEM),     # noise_w scalar
            pl.BlockSpec((Bc, Cr, HW), lambda g: (g, 0, 0)),       # input
            pl.BlockSpec((Bc, Cr, HW), lambda g: (g, 0, 0)),       # noise
            pl.BlockSpec((Bc, 1, HW), lambda g: (g, 0, 0)),        # mask
            pl.BlockSpec((Bc, 1, Sd), lambda g: (g, 0, 0)),        # style
            pl.BlockSpec((Sd, KK * Cin), lambda g: (0, 0)),        # modw (tiled)
            pl.BlockSpec((1, KK * Cin), lambda g: (0, 0)),         # modb (tiled)
            pl.BlockSpec((Cout, KK * Cin), lambda g: (0, 0)),      # flat conv weight
            pl.BlockSpec((1, Cout), lambda g: (0, 0)),             # ToMask w2 (hoisted)
        ],
        out_specs=(
            pl.BlockSpec((Bc, Cout, HW), lambda g: (g, 0, 0)),
            pl.BlockSpec((Bc, 1, HW), lambda g: (g, 0, 0)),
        ),
        compiler_params=pltpu.CompilerParams(
            dimension_semantics=("parallel",)),
    )(params["noise_w"],
      inp.reshape(B, Cr, HW), noise.reshape(B, Cr, HW), mask.reshape(B, 1, HW),
      style[:, None, :],
      params["modw_t"], params["modb_t"], params["w_flat_s"], params["w2_mod"])

    # TODO(synk): ToMask.upsample (upfirdn2d blur) branch is unexercised because
    # mask and drv share the same spatial size here (upsample=False path).
    return drv.reshape(B, Cout, H, W), mout.reshape(B, 1, H, W)


# --------------------------------------------------------------------------
# Parameter init (shapes follow the PyTorch __init__; values deterministic).
# torch initializes NoiseInjection.weight and ToMask.style to zeros; we use
# deterministic nonzero values so the whole compute path is exercised.
# --------------------------------------------------------------------------
def init_params(key, Cr, Cout, K, Sd):
    Cin = 2 * Cr
    KK = K * K
    k1, k2, k3, k4, k5 = jax.random.split(key, 5)
    p = {}
    # ModulatedConv2d(Cin, Cout, K, Sd, demodulate=True)
    p["conv_w"] = jax.random.normal(k1, (1, Cout, Cin, K, K), jnp.float32)
    p["conv_scale"] = 1.0 / math.sqrt(Cin * K * K)
    # flat (Cout, K*K*Cin) layout, index [o, (ky*K+kx)*Cin + c]
    wt = jnp.transpose(p["conv_w"][0], (0, 2, 3, 1))           # (Cout, K, K, Cin)
    p["w_flat_s"] = (p["conv_scale"] * wt).reshape(Cout, KK * Cin)
    #   modulation = EqualLinear(Sd, Cin, bias_init=1); pre-scaled, pre-transposed,
    #   and tiled KK times so the kernel modulates the flat weight directly.
    lin_scale = 1.0 / math.sqrt(Sd)
    modw = jax.random.normal(k2, (Cin, Sd), jnp.float32)
    p["modw_st"] = (modw * lin_scale).T                        # (Sd, Cin)
    p["modb_row"] = jnp.ones((1, Cin), jnp.float32)            # bias_init=1
    p["modw_t"] = jnp.tile(p["modw_st"], (1, KK))              # (Sd, KK*Cin)
    p["modb_t"] = jnp.ones((1, KK * Cin), jnp.float32)
    # NoiseInjection.weight (scalar)
    p["noise_w"] = jnp.full((1, 1), 0.5, jnp.float32)
    # ToMask: style param (1, Sd); conv = ModulatedConv2d(Cout, 1, 1, Sd, demod=False)
    p["tstyle"] = jax.random.normal(k3, (1, Sd), jnp.float32)
    w2 = jax.random.normal(k4, (1, 1, Cout, 1, 1), jnp.float32)
    p["w2_s"] = (w2 * (1.0 / math.sqrt(Cout))).reshape(1, Cout)
    mod2w = jax.random.normal(k5, (Cout, Sd), jnp.float32)
    p["mod2w_st"] = (mod2w * lin_scale).T                      # (Sd, Cout)
    p["mod2b_row"] = jnp.ones((1, Cout), jnp.float32)          # bias_init=1
    # ToMask modulation is parameter-only (self.style is a Parameter) -> hoist.
    s2 = p["tstyle"] @ p["mod2w_st"] + p["mod2b_row"]          # (1, Cout)
    p["w2_mod"] = p["w2_s"] * s2
    return p


# --------------------------------------------------------------------------
# Pure-JAX reference for verification
# --------------------------------------------------------------------------
def reference_forward(inp, style, mask, noise, p, K):
    B, Cr, H, W = inp.shape
    nw = p["noise_w"][0, 0]
    x = jnp.concatenate([mask * inp, nw * (1.0 - mask) * noise], axis=1)
    s = style @ p["modw_st"] + p["modb_row"][0]                      # (B, Cin)
    w = p["conv_scale"] * p["conv_w"] * s[:, None, :, None, None]    # (B,Co,Ci,K,K)
    demod = jax.lax.rsqrt(jnp.sum(w * w, axis=(2, 3, 4)) + 1e-8)
    w = w * demod[:, :, None, None, None]
    drv = jnp.stack([
        jax.lax.conv_general_dilated(
            x[i:i + 1], w[i], (1, 1), "SAME",
            dimension_numbers=("NCHW", "OIHW", "NCHW"))[0]
        for i in range(B)], axis=0)
    s2 = p["tstyle"] @ p["mod2w_st"] + p["mod2b_row"][0]             # (1, Cout)
    w2m = p["w2_s"] * s2                                             # (1, Cout)
    mnew = jnp.einsum("oc,bchw->bohw", w2m, drv)
    return drv, mnew + mask


if __name__ == "__main__":
    B, Cr, H, W = 2, 4, 16, 16       # raw input channels Cr; conv sees 2*Cr
    Cout, K, Sd = 8, 3, 32

    key = jax.random.PRNGKey(0)
    kx_, kn, km, ks, kp = jax.random.split(key, 5)
    inp = jax.random.normal(kx_, (B, Cr, H, W), jnp.float32)
    noise = jax.random.normal(kn, (B, Cr, H, W), jnp.float32)
    mask = jax.random.uniform(km, (B, 1, H, W), jnp.float32)
    style = jax.random.normal(ks, (B, Sd), jnp.float32)
    params = init_params(kp, Cr, Cout, K, Sd)

    drv_gold, mask_gold = reference_forward(inp, style, mask, noise, params, K)

    # Exercise both layouts: whole-batch-per-step (single-TC v5e/v6e) and
    # one-chunk-per-TensorCore (v7x megacore).
    for nchunks in (1, min(2, B)):
        drv, mask_out = masked_styled_conv_forward(
            inp, style, mask, noise, params, K, num_chunks=nchunks)
        jax.block_until_ready((drv, mask_out))
        assert drv.shape == (B, Cout, H, W)
        assert mask_out.shape == (B, 1, H, W)
        # Tolerance sized for bf16 MXU operands (f32 accumulation); border /
        # indexing bugs produce O(1) errors and would still trip this check.
        assert np.allclose(np.asarray(drv), np.asarray(drv_gold),
                           rtol=5e-2, atol=5e-2)
        assert np.allclose(np.asarray(mask_out), np.asarray(mask_gold),
                           rtol=5e-2, atol=5e-2)
    print("KERNEL_OK")
</pallas_src>

<mosaic_0001>
module attributes {stable_mosaic.version = 11 : i64} {
  func.func @_fused_kernel(%arg0: i32, %arg1: memref<1x1xf32, #tpu.memory_space<smem>>, %arg2: memref<2x4x256xf32, #tpu.memory_space<vmem>>, %arg3: memref<2x4x256xf32, #tpu.memory_space<vmem>>, %arg4: memref<2x1x256xf32, #tpu.memory_space<vmem>>, %arg5: memref<2x1x32xf32, #tpu.memory_space<vmem>>, %arg6: memref<32x72xf32, #tpu.memory_space<vmem>>, %arg7: memref<1x72xf32, #tpu.memory_space<vmem>>, %arg8: memref<8x72xf32, #tpu.memory_space<vmem>>, %arg9: memref<1x8xf32, #tpu.memory_space<vmem>>, %arg10: memref<2x8x256xf32, #tpu.memory_space<vmem>>, %arg11: memref<2x1x256xf32, #tpu.memory_space<vmem>>) attributes {dimension_semantics = [#tpu.dimension_semantics<parallel>], iteration_bounds = array<i64: 1>, scalar_prefetch = 0 : i64, scratch_operands = 0 : i64, tpu.core_type = #tpu.core_type<tc>, window_params = [{transform_indices = @transform_0, window_bounds = array<i64: 1, 1>}, {transform_indices = @transform_1, window_bounds = array<i64: 2, 4, 256>}, {transform_indices = @transform_2, window_bounds = array<i64: 2, 4, 256>}, {transform_indices = @transform_3, window_bounds = array<i64: 2, 1, 256>}, {transform_indices = @transform_4, window_bounds = array<i64: 2, 1, 32>}, {pipeline_mode = #tpu.pipeline_mode<synchronous>, transform_indices = @transform_5, window_bounds = array<i64: 32, 72>}, {pipeline_mode = #tpu.pipeline_mode<synchronous>, transform_indices = @transform_6, window_bounds = array<i64: 1, 72>}, {pipeline_mode = #tpu.pipeline_mode<synchronous>, transform_indices = @transform_7, window_bounds = array<i64: 8, 72>}, {pipeline_mode = #tpu.pipeline_mode<synchronous>, transform_indices = @transform_8, window_bounds = array<i64: 1, 8>}, {transform_indices = @transform_9, window_bounds = array<i64: 2, 8, 256>}, {transform_indices = @transform_10, window_bounds = array<i64: 2, 1, 256>}]} {
    %c0 = arith.constant 0 : index
    %c0_0 = arith.constant 0 : index
    %0 = memref.load %arg1[%c0, %c0_0] : memref<1x1xf32, #tpu.memory_space<smem>>
    %1 = tpu.iota {dimensions = array<i32: 1>} : vector<1x256xi32>
    %c16_i32 = arith.constant 16 : i32
    %c0_i32 = arith.constant 0 : i32
    %2 = arith.cmpi eq, %c16_i32, %c0_i32 : i32
    %c1_i32 = arith.constant 1 : i32
    %3 = arith.select %2, %c1_i32, %c16_i32 : i32
    %4 = vector.broadcast %3 : i32 to vector<1x256xi32>
    %5 = arith.remsi %1, %4 : vector<1x256xi32>
    %c0_i32_1 = arith.constant 0 : i32
    %6 = vector.broadcast %c0_i32_1 : i32 to vector<1x256xi32>
    %7 = arith.cmpi ne, %5, %6 : vector<1x256xi32>
    %c0_i32_2 = arith.constant 0 : i32
    %8 = vector.broadcast %c0_i32_2 : i32 to vector<1x256xi32>
    %9 = arith.cmpi slt, %5, %8 : vector<1x256xi32>
    %c0_i32_3 = arith.constant 0 : i32
    %10 = arith.cmpi slt, %3, %c0_i32_3 : i32
    %11 = vector.broadcast %10 : i1 to vector<1x256xi1>
    %12 = vector.broadcast %11 : vector<1x256xi1> to vector<1x256xi1>
    %13 = arith.xori %9, %12 : vector<1x256xi1>
    %14 = arith.andi %13, %7 : vector<1x256xi1>
    %15 = vector.broadcast %3 : i32 to vector<1x256xi32>
    %16 = arith.addi %5, %15 : vector<1x256xi32>
    %17 = arith.select %14, %16, %5 : vector<1x256xi1>, vector<1x256xi32>
    %c1_i32_4 = arith.constant 1 : i32
    %18 = vector.broadcast %c1_i32_4 : i32 to vector<1x256xi32>
    %19 = arith.cmpi sge, %17, %18 : vector<1x256xi32>
    %c15_i32 = arith.constant 15 : i32
    %20 = vector.broadcast %c15_i32 : i32 to vector<1x256xi32>
    %21 = arith.cmpi slt, %17, %20 : vector<1x256xi32>
    %c16_i32_5 = arith.constant 16 : i32
    %22 = vector.broadcast %c16_i32_5 : i32 to vector<1x256xi32>
    %23 = arith.cmpi sge, %1, %22 : vector<1x256xi32>
    %c240_i32 = arith.constant 240 : i32
    %24 = vector.broadcast %c240_i32 : i32 to vector<1x256xi32>
    %25 = arith.cmpi slt, %1, %24 : vector<1x256xi32>
    %c0_6 = arith.constant 0 : index
    %c0_7 = arith.constant 0 : index
    %c0_8 = arith.constant 0 : index
    %26 = vector.load %arg5[%c0_6, %c0_7, %c0_8] : memref<2x1x32xf32, #tpu.memory_space<vmem>>, vector<2x1x32xf32>
    %27 = vector.shape_cast %26 : vector<2x1x32xf32> to vector<2x32xf32>
    %c0_9 = arith.constant 0 : index
    %c0_10 = arith.constant 0 : index
    %28 = vector.load %arg6[%c0_9, %c0_10] : memref<32x72xf32, #tpu.memory_space<vmem>>, vector<32x72xf32>
    %cst = arith.constant dense<0.000000e+00> : vector<2x72xf32>
    %29 = tpu.matmul %27, %28, %cst {dimension_numbers = #tpu.dot_dimension_numbers<[1], [0], [0], [1], [0, 0, 1, 1], [], []>} : vector<2x32xf32>, vector<32x72xf32>, vector<2x72xf32> -> vector<2x72xf32>
    %c0_11 = arith.constant 0 : index
    %c0_12 = arith.constant 0 : index
    %30 = vector.load %arg7[%c0_11, %c0_12] : memref<1x72xf32, #tpu.memory_space<vmem>>, vector<1x72xf32>
    %31 = vector.broadcast %30 : vector<1x72xf32> to vector<2x72xf32>
    %32 = arith.addf %29, %31 : vector<2x72xf32>
    %c0_13 = arith.constant 0 : index
    %c0_14 = arith.constant 0 : index
    %33 = vector.load %arg8[%c0_13, %c0_14] : memref<8x72xf32, #tpu.memory_space<vmem>>, vector<8x72xf32>
    %c0_15 = arith.constant 0 : index
    %c0_16 = arith.constant 0 : index
    %34 = vector.load %arg9[%c0_15, %c0_16] : memref<1x8xf32, #tpu.memory_space<vmem>>, vector<1x8xf32>
    %c0_17 = arith.constant 0 : index
    %c0_18 = arith.constant 0 : index
    %c0_19 = arith.constant 0 : index
    %35 = vector.load %arg4[%c0_17, %c0_18, %c0_19] : memref<2x1x256xf32, #tpu.memory_space<vmem>>, vector<1x1x256xf32>
    %36 = vector.shape_cast %35 : vector<1x1x256xf32> to vector<1x256xf32>
    %c0_20 = arith.constant 0 : index
    %c0_21 = arith.constant 0 : index
    %c0_22 = arith.constant 0 : index
    %37 = vector.load %arg2[%c0_20, %c0_21, %c0_22] : memref<2x4x256xf32, #tpu.memory_space<vmem>>, vector<1x4x256xf32>
    %38 = vector.shape_cast %37 : vector<1x4x256xf32> to vector<4x256xf32>
    %39 = vector.broadcast %36 : vector<1x256xf32> to vector<4x256xf32>
    %40 = arith.mulf %39, %38 : vector<4x256xf32>
    %cst_23 = arith.constant 1.000000e+00 : f32
    %41 = vector.broadcast %cst_23 : f32 to vector<1x256xf32>
    %42 = arith.subf %41, %36 : vector<1x256xf32>
    %43 = vector.broadcast %0 : f32 to vector<1x256xf32>
    %44 = arith.mulf %43, %42 : vector<1x256xf32>
    %c0_24 = arith.constant 0 : index
    %c0_25 = arith.constant 0 : index
    %c0_26 = arith.constant 0 : index
    %45 = vector.load %arg3[%c0_24, %c0_25, %c0_26] : memref<2x4x256xf32, #tpu.memory_space<vmem>>, vector<1x4x256xf32>
    %46 = vector.shape_cast %45 : vector<1x4x256xf32> to vector<4x256xf32>
    %47 = vector.broadcast %44 : vector<1x256xf32> to vector<4x256xf32>
    %48 = arith.mulf %47, %46 : vector<4x256xf32>
    %49 = tpu.concatenate %40, %48 in 0 : vector<4x256xf32>, vector<4x256xf32> -> vector<8x256xf32>
    %50 = vector.extract_strided_slice %32 {offsets = [0, 0], sizes = [1, 72], strides = [1, 1]} : vector<2x72xf32> to vector<1x72xf32>
    %51 = vector.broadcast %50 : vector<1x72xf32> to vector<8x72xf32>
    %52 = arith.mulf %33, %51 : vector<8x72xf32>
    %53 = arith.mulf %52, %52 : vector<8x72xf32>
    %cst_27 = arith.constant dense<0.000000e+00> : vector<8xf32>
    %54 = vector.multi_reduction <add>, %53, %cst_27 [1] : vector<8x72xf32> to vector<8xf32>
    %55 = vector.shape_cast %54 : vector<8xf32> to vector<8x1xf32>
    %cst_28 = arith.constant 9.99999993E-9 : f32
    %56 = vector.broadcast %cst_28 : f32 to vector<8x1xf32>
    %57 = arith.addf %55, %56 : vector<8x1xf32>
    %58 = math.rsqrt %57 : vector<8x1xf32>
    %59 = vector.broadcast %58 : vector<8x1xf32> to vector<8x72xf32>
    %60 = arith.mulf %52, %59 : vector<8x72xf32>
    %cst_29 = arith.constant dense<0.000000e+00> : vector<1x72xf32>
    %61 = tpu.matmul %34, %60, %cst_29 {dimension_numbers = #tpu.dot_dimension_numbers<[1], [0], [0], [1], [0, 0, 1, 1], [], []>} : vector<1x8xf32>, vector<8x72xf32>, vector<1x72xf32> -> vector<1x72xf32>
    %62 = tpu.concatenate %60, %61 in 0 : vector<8x72xf32>, vector<1x72xf32> -> vector<9x72xf32>
    %c17_i32 = arith.constant 17 : i32
    %63 = tpu.dynamic_rotate %49 by %c17_i32 dim 1 : vector<8x256xf32>, i32 -> vector<8x256xf32>
    %64 = arith.andi %23, %19 : vector<1x256xi1>
    %cst_30 = arith.constant 0.000000e+00 : f32
    %65 = vector.shape_cast %64 : vector<1x256xi1> to vector<1x256xi1>
    %66 = vector.broadcast %65 : vector<1x256xi1> to vector<8x256xi1>
    %67 = vector.broadcast %cst_30 : f32 to vector<8x256xf32>
    %68 = arith.select %66, %63, %67 : vector<8x256xi1>, vector<8x256xf32>
    %c16_i32_31 = arith.constant 16 : i32
    %69 = tpu.dynamic_rotate %49 by %c16_i32_31 dim 1 : vector<8x256xf32>, i32 -> vector<8x256xf32>
    %cst_32 = arith.constant 0.000000e+00 : f32
    %70 = vector.shape_cast %23 : vector<1x256xi1> to vector<1x256xi1>
    %71 = vector.broadcast %70 : vector<1x256xi1> to vector<8x256xi1>
    %72 = vector.broadcast %cst_32 : f32 to vector<8x256xf32>
    %73 = arith.select %71, %69, %72 : vector<8x256xi1>, vector<8x256xf32>
    %c15_i32_33 = arith.constant 15 : i32
    %74 = tpu.dynamic_rotate %49 by %c15_i32_33 dim 1 : vector<8x256xf32>, i32 -> vector<8x256xf32>
    %75 = arith.andi %23, %21 : vector<1x256xi1>
    %cst_34 = arith.constant 0.000000e+00 : f32
    %76 = vector.shape_cast %75 : vector<1x256xi1> to vector<1x256xi1>
    %77 = vector.broadcast %76 : vector<1x256xi1> to vector<8x256xi1>
    %78 = vector.broadcast %cst_34 : f32 to vector<8x256xf32>
    %79 = arith.select %77, %74, %78 : vector<8x256xi1>, vector<8x256xf32>
    %c1_i32_35 = arith.constant 1 : i32
    %80 = tpu.dynamic_rotate %49 by %c1_i32_35 dim 1 : vector<8x256xf32>, i32 -> vector<8x256xf32>
    %cst_36 = arith.constant 0.000000e+00 : f32
    %81 = vector.shape_cast %19 : vector<1x256xi1> to vector<1x256xi1>
    %82 = vector.broadcast %81 : vector<1x256xi1> to vector<8x256xi1>
    %83 = vector.broadcast %cst_36 : f32 to vector<8x256xf32>
    %84 = arith.select %82, %80, %83 : vector<8x256xi1>, vector<8x256xf32>
    %c255_i32 = arith.constant 255 : i32
    %85 = tpu.dynamic_rotate %49 by %c255_i32 dim 1 : vector<8x256xf32>, i32 -> vector<8x256xf32>
    %cst_37 = arith.constant 0.000000e+00 : f32
    %86 = vector.shape_cast %21 : vector<1x256xi1> to vector<1x256xi1>
    %87 = vector.broadcast %86 : vector<1x256xi1> to vector<8x256xi1>
    %88 = vector.broadcast %cst_37 : f32 to vector<8x256xf32>
    %89 = arith.select %87, %85, %88 : vector<8x256xi1>, vector<8x256xf32>
    %c241_i32 = arith.constant 241 : i32
    %90 = tpu.dynamic_rotate %49 by %c241_i32 dim 1 : vector<8x256xf32>, i32 -> vector<8x256xf32>
    %91 = arith.andi %25, %19 : vector<1x256xi1>
    %cst_38 = arith.constant 0.000000e+00 : f32
    %92 = vector.shape_cast %91 : vector<1x256xi1> to vector<1x256xi1>
    %93 = vector.broadcast %92 : vector<1x256xi1> to vector<8x256xi1>
    %94 = vector.broadcast %cst_38 : f32 to vector<8x256xf32>
    %95 = arith.select %93, %90, %94 : vector<8x256xi1>, vector<8x256xf32>
    %c240_i32_39 = arith.constant 240 : i32
    %96 = tpu.dynamic_rotate %49 by %c240_i32_39 dim 1 : vector<8x256xf32>, i32 -> vector<8x256xf32>
    %cst_40 = arith.constant 0.000000e+00 : f32
    %97 = vector.shape_cast %25 : vector<1x256xi1> to vector<1x256xi1>
    %98 = vector.broadcast %97 : vector<1x256xi1> to vector<8x256xi1>
    %99 = vector.broadcast %cst_40 : f32 to vector<8x256xf32>
    %100 = arith.select %98, %96, %99 : vector<8x256xi1>, vector<8x256xf32>
    %c239_i32 = arith.constant 239 : i32
    %101 = tpu.dynamic_rotate %49 by %c239_i32 dim 1 : vector<8x256xf32>, i32 -> vector<8x256xf32>
    %102 = arith.andi %25, %21 : vector<1x256xi1>
    %cst_41 = arith.constant 0.000000e+00 : f32
    %103 = vector.shape_cast %102 : vector<1x256xi1> to vector<1x256xi1>
    %104 = vector.broadcast %103 : vector<1x256xi1> to vector<8x256xi1>
    %105 = vector.broadcast %cst_41 : f32 to vector<8x256xf32>
    %106 = arith.select %104, %101, %105 : vector<8x256xi1>, vector<8x256xf32>
    %107 = tpu.concatenate %68, %73, %79, %84, %49, %89, %95, %100, %106 in 0 : vector<8x256xf32>, vector<8x256xf32>, vector<8x256xf32>, vector<8x256xf32>, vector<8x256xf32>, vector<8x256xf32>, vector<8x256xf32>, vector<8x256xf32>, vector<8x256xf32> -> vector<72x256xf32>
    %108 = arith.truncf %62 : vector<9x72xf32> to vector<9x72xbf16>
    %109 = arith.truncf %107 : vector<72x256xf32> to vector<72x256xbf16>
    %cst_42 = arith.constant dense<0.000000e+00> : vector<9x256xf32>
    %110 = tpu.matmul %108, %109, %cst_42 {dimension_numbers = #tpu.dot_dimension_numbers<[1], [0], [0], [1], [0, 0, 1, 1], [], []>} : vector<9x72xbf16>, vector<72x256xbf16>, vector<9x256xf32> -> vector<9x256xf32>
    %111 = vector.extract_strided_slice %110 {offsets = [0, 0], sizes = [8, 256], strides = [1, 1]} : vector<9x256xf32> to vector<8x256xf32>
    %c0_43 = arith.constant 0 : index
    %c0_44 = arith.constant 0 : index
    %c0_45 = arith.constant 0 : index
    %112 = vector.load %arg10[%c0_43, %c0_44, %c0_45] : memref<2x8x256xf32, #tpu.memory_space<vmem>>, vector<1x8x256xf32>
    %113 = vector.shape_cast %112 : vector<1x8x256xf32> to vector<8x256xf32>
    %114 = vector.shape_cast %111 : vector<8x256xf32> to vector<1x8x256xf32>
    tpu.vector_store %arg10[%c0_43, %c0_44, %c0_45], %114 {strides = array<i32>} : memref<2x8x256xf32, #tpu.memory_space<vmem>>, vector<1x8x256xf32>,
    %115 = vector.extract_strided_slice %110 {offsets = [8, 0], sizes = [1, 256], strides = [1, 1]} : vector<9x256xf32> to vector<1x256xf32>
    %116 = arith.addf %115, %36 : vector<1x256xf32>
    %c0_46 = arith.constant 0 : index
    %c0_47 = arith.constant 0 : index
    %c0_48 = arith.constant 0 : index
    %117 = vector.load %arg11[%c0_46, %c0_47, %c0_48] : memref<2x1x256xf32, #tpu.memory_space<vmem>>, vector<1x1x256xf32>
    %118 = vector.shape_cast %117 : vector<1x1x256xf32> to vector<1x256xf32>
    %119 = vector.shape_cast %116 : vector<1x256xf32> to vector<1x1x256xf32>
    tpu.vector_store %arg11[%c0_46, %c0_47, %c0_48], %119 {strides = array<i32>} : memref<2x1x256xf32, #tpu.memory_space<vmem>>, vector<1x1x256xf32>,
    %c1 = arith.constant 1 : index
    %c0_49 = arith.constant 0 : index
    %c0_50 = arith.constant 0 : index
    %120 = vector.load %arg4[%c1, %c0_49, %c0_50] : memref<2x1x256xf32, #tpu.memory_space<vmem>>, vector<1x1x256xf32>
    %121 = vector.shape_cast %120 : vector<1x1x256xf32> to vector<1x256xf32>
    %c1_51 = arith.constant 1 : index
    %c0_52 = arith.constant 0 : index
    %c0_53 = arith.constant 0 : index
    %122 = vector.load %arg2[%c1_51, %c0_52, %c0_53] : memref<2x4x256xf32, #tpu.memory_space<vmem>>, vector<1x4x256xf32>
    %123 = vector.shape_cast %122 : vector<1x4x256xf32> to vector<4x256xf32>
    %124 = vector.broadcast %121 : vector<1x256xf32> to vector<4x256xf32>
    %125 = arith.mulf %124, %123 : vector<4x256xf32>
    %cst_54 = arith.constant 1.000000e+00 : f32
    %126 = vector.broadcast %cst_54 : f32 to vector<1x256xf32>
    %127 = arith.subf %126, %121 : vector<1x256xf32>
    %128 = vector.broadcast %0 : f32 to vector<1x256xf32>
    %129 = arith.mulf %128, %127 : vector<1x256xf32>
    %c1_55 = arith.constant 1 : index
    %c0_56 = arith.constant 0 : index
    %c0_57 = arith.constant 0 : index
    %130 = vector.load %arg3[%c1_55, %c0_56, %c0_57] : memref<2x4x256xf32, #tpu.memory_space<vmem>>, vector<1x4x256xf32>
    %131 = vector.shape_cast %130 : vector<1x4x256xf32> to vector<4x256xf32>
    %132 = vector.broadcast %129 : vector<1x256xf32> to vector<4x256xf32>
    %133 = arith.mulf %132, %131 : vector<4x256xf32>
    %134 = tpu.concatenate %125, %133 in 0 : vector<4x256xf32>, vector<4x256xf32> -> vector<8x256xf32>
    %135 = vector.extract_strided_slice %32 {offsets = [1, 0], sizes = [1, 72], strides = [1, 1]} : vector<2x72xf32> to vector<1x72xf32>
    %136 = vector.broadcast %135 : vector<1x72xf32> to vector<8x72xf32>
    %137 = arith.mulf %33, %136 : vector<8x72xf32>
    %138 = arith.mulf %137, %137 : vector<8x72xf32>
    %cst_58 = arith.constant dense<0.000000e+00> : vector<8xf32>
    %139 = vector.multi_reduction <add>, %138, %cst_58 [1] : vector<8x72xf32> to vector<8xf32>
    %140 = vector.shape_cast %139 : vector<8xf32> to vector<8x1xf32>
    %cst_59 = arith.constant 9.99999993E-9 : f32
    %141 = vector.broadcast %cst_59 : f32 to vector<8x1xf32>
    %142 = arith.addf %140, %141 : vector<8x1xf32>
    %143 = math.rsqrt %142 : vector<8x1xf32>
    %144 = vector.broadcast %143 : vector<8x1xf32> to vector<8x72xf32>
    %145 = arith.mulf %137, %144 : vector<8x72xf32>
    %cst_60 = arith.constant dense<0.000000e+00> : vector<1x72xf32>
    %146 = tpu.matmul %34, %145, %cst_60 {dimension_numbers = #tpu.dot_dimension_numbers<[1], [0], [0], [1], [0, 0, 1, 1], [], []>} : vector<1x8xf32>, vector<8x72xf32>, vector<1x72xf32> -> vector<1x72xf32>
    %147 = tpu.concatenate %145, %146 in 0 : vector<8x72xf32>, vector<1x72xf32> -> vector<9x72xf32>
    %c17_i32_61 = arith.constant 17 : i32
    %148 = tpu.dynamic_rotate %134 by %c17_i32_61 dim 1 : vector<8x256xf32>, i32 -> vector<8x256xf32>
    %149 = arith.andi %23, %19 : vector<1x256xi1>
    %cst_62 = arith.constant 0.000000e+00 : f32
    %150 = vector.shape_cast %149 : vector<1x256xi1> to vector<1x256xi1>
    %151 = vector.broadcast %150 : vector<1x256xi1> to vector<8x256xi1>
    %152 = vector.broadcast %cst_62 : f32 to vector<8x256xf32>
    %153 = arith.select %151, %148, %152 : vector<8x256xi1>, vector<8x256xf32>
    %c16_i32_63 = arith.constant 16 : i32
    %154 = tpu.dynamic_rotate %134 by %c16_i32_63 dim 1 : vector<8x256xf32>, i32 -> vector<8x256xf32>
    %cst_64 = arith.constant 0.000000e+00 : f32
    %155 = vector.shape_cast %23 : vector<1x256xi1> to vector<1x256xi1>
    %156 = vector.broadcast %155 : vector<1x256xi1> to vector<8x256xi1>
    %157 = vector.broadcast %cst_64 : f32 to vector<8x256xf32>
    %158 = arith.select %156, %154, %157 : vector<8x256xi1>, vector<8x256xf32>
    %c15_i32_65 = arith.constant 15 : i32
    %159 = tpu.dynamic_rotate %134 by %c15_i32_65 dim 1 : vector<8x256xf32>, i32 -> vector<8x256xf32>
    %160 = arith.andi %23, %21 : vector<1x256xi1>
    %cst_66 = arith.constant 0.000000e+00 : f32
    %161 = vector.shape_cast %160 : vector<1x256xi1> to vector<1x256xi1>
    %162 = vector.broadcast %161 : vector<1x256xi1> to vector<8x256xi1>
    %163 = vector.broadcast %cst_66 : f32 to vector<8x256xf32>
    %164 = arith.select %162, %159, %163 : vector<8x256xi1>, vector<8x256xf32>
    %c1_i32_67 = arith.constant 1 : i32
    %165 = tpu.dynamic_rotate %134 by %c1_i32_67 dim 1 : vector<8x256xf32>, i32 -> vector<8x256xf32>
    %cst_68 = arith.constant 0.000000e+00 : f32
    %166 = vector.shape_cast %19 : vector<1x256xi1> to vector<1x256xi1>
    %167 = vector.broadcast %166 : vector<1x256xi1> to vector<8x256xi1>
    %168 = vector.broadcast %cst_68 : f32 to vector<8x256xf32>
    %169 = arith.select %167, %165, %168 : vector<8x256xi1>, vector<8x256xf32>
    %c255_i32_69 = arith.constant 255 : i32
    %170 = tpu.dynamic_rotate %134 by %c255_i32_69 dim 1 : vector<8x256xf32>, i32 -> vector<8x256xf32>
    %cst_70 = arith.constant 0.000000e+00 : f32
    %171 = vector.shape_cast %21 : vector<1x256xi1> to vector<1x256xi1>
    %172 = vector.broadcast %171 : vector<1x256xi1> to vector<8x256xi1>
    %173 = vector.broadcast %cst_70 : f32 to vector<8x256xf32>
    %174 = arith.select %172, %170, %173 : vector<8x256xi1>, vector<8x256xf32>
    %c241_i32_71 = arith.constant 241 : i32
    %175 = tpu.dynamic_rotate %134 by %c241_i32_71 dim 1 : vector<8x256xf32>, i32 -> vector<8x256xf32>
    %176 = arith.andi %25, %19 : vector<1x256xi1>
    %cst_72 = arith.constant 0.000000e+00 : f32
    %177 = vector.shape_cast %176 : vector<1x256xi1> to vector<1x256xi1>
    %178 = vector.broadcast %177 : vector<1x256xi1> to vector<8x256xi1>
    %179 = vector.broadcast %cst_72 : f32 to vector<8x256xf32>
    %180 = arith.select %178, %175, %179 : vector<8x256xi1>, vector<8x256xf32>
    %c240_i32_73 = arith.constant 240 : i32
    %181 = tpu.dynamic_rotate %134 by %c240_i32_73 dim 1 : vector<8x256xf32>, i32 -> vector<8x256xf32>
    %cst_74 = arith.constant 0.000000e+00 : f32
    %182 = vector.shape_cast %25 : vector<1x256xi1> to vector<1x256xi1>
    %183 = vector.broadcast %182 : vector<1x256xi1> to vector<8x256xi1>
    %184 = vector.broadcast %cst_74 : f32 to vector<8x256xf32>
    %185 = arith.select %183, %181, %184 : vector<8x256xi1>, vector<8x256xf32>
    %c239_i32_75 = arith.constant 239 : i32
    %186 = tpu.dynamic_rotate %134 by %c239_i32_75 dim 1 : vector<8x256xf32>, i32 -> vector<8x256xf32>
    %187 = arith.andi %25, %21 : vector<1x256xi1>
    %cst_76 = arith.constant 0.000000e+00 : f32
    %188 = vector.shape_cast %187 : vector<1x256xi1> to vector<1x256xi1>
    %189 = vector.broadcast %188 : vector<1x256xi1> to vector<8x256xi1>
    %190 = vector.broadcast %cst_76 : f32 to vector<8x256xf32>
    %191 = arith.select %189, %186, %190 : vector<8x256xi1>, vector<8x256xf32>
    %192 = tpu.concatenate %153, %158, %164, %169, %134, %174, %180, %185, %191 in 0 : vector<8x256xf32>, vector<8x256xf32>, vector<8x256xf32>, vector<8x256xf32>, vector<8x256xf32>, vector<8x256xf32>, vector<8x256xf32>, vector<8x256xf32>, vector<8x256xf32> -> vector<72x256xf32>
    %193 = arith.truncf %147 : vector<9x72xf32> to vector<9x72xbf16>
    %194 = arith.truncf %192 : vector<72x256xf32> to vector<72x256xbf16>
    %cst_77 = arith.constant dense<0.000000e+00> : vector<9x256xf32>
    %195 = tpu.matmul %193, %194, %cst_77 {dimension_numbers = #tpu.dot_dimension_numbers<[1], [0], [0], [1], [0, 0, 1, 1], [], []>} : vector<9x72xbf16>, vector<72x256xbf16>, vector<9x256xf32> -> vector<9x256xf32>
    %196 = vector.extract_strided_slice %195 {offsets = [0, 0], sizes = [8, 256], strides = [1, 1]} : vector<9x256xf32> to vector<8x256xf32>
    %c1_78 = arith.constant 1 : index
    %c0_79 = arith.constant 0 : index
    %c0_80 = arith.constant 0 : index
    %197 = vector.load %arg10[%c1_78, %c0_79, %c0_80] : memref<2x8x256xf32, #tpu.memory_space<vmem>>, vector<1x8x256xf32>
    %198 = vector.shape_cast %197 : vector<1x8x256xf32> to vector<8x256xf32>
    %199 = vector.shape_cast %196 : vector<8x256xf32> to vector<1x8x256xf32>
    tpu.vector_store %arg10[%c1_78, %c0_79, %c0_80], %199 {strides = array<i32>} : memref<2x8x256xf32, #tpu.memory_space<vmem>>, vector<1x8x256xf32>,
    %200 = vector.extract_strided_slice %195 {offsets = [8, 0], sizes = [1, 256], strides = [1, 1]} : vector<9x256xf32> to vector<1x256xf32>
    %201 = arith.addf %200, %121 : vector<1x256xf32>
    %c1_81 = arith.constant 1 : index
    %c0_82 = arith.constant 0 : index
    %c0_83 = arith.constant 0 : index
    %202 = vector.load %arg11[%c1_81, %c0_82, %c0_83] : memref<2x1x256xf32, #tpu.memory_space<vmem>>, vector<1x1x256xf32>
    %203 = vector.shape_cast %202 : vector<1x1x256xf32> to vector<1x256xf32>
    %204 = vector.shape_cast %201 : vector<1x256xf32> to vector<1x1x256xf32>
    tpu.vector_store %arg11[%c1_81, %c0_82, %c0_83], %204 {strides = array<i32>} : memref<2x1x256xf32, #tpu.memory_space<vmem>>, vector<1x1x256xf32>,
    return
  }
  func.func @transform_0(%arg0: i32) -> (i32, i32) {
    %c0_i32 = arith.constant 0 : i32
    %c0_i32_0 = arith.constant 0 : i32
    %c0_i32_1 = arith.constant 0 : i32
    return %c0_i32, %c0_i32_0 : i32, i32
  }
  func.func @transform_1(%arg0: i32) -> (i32, i32, i32) {
    %c0_i32 = arith.constant 0 : i32
    %c0_i32_0 = arith.constant 0 : i32
    %c0_i32_1 = arith.constant 0 : i32
    return %arg0, %c0_i32, %c0_i32_0 : i32, i32, i32
  }
  func.func @transform_2(%arg0: i32) -> (i32, i32, i32) {
    %c0_i32 = arith.constant 0 : i32
    %c0_i32_0 = arith.constant 0 : i32
    %c0_i32_1 = arith.constant 0 : i32
    return %arg0, %c0_i32, %c0_i32_0 : i32, i32, i32
  }
  func.func @transform_3(%arg0: i32) -> (i32, i32, i32) {
    %c0_i32 = arith.constant 0 : i32
    %c0_i32_0 = arith.constant 0 : i32
    %c0_i32_1 = arith.constant 0 : i32
    return %arg0, %c0_i32, %c0_i32_0 : i32, i32, i32
  }
  func.func @transform_4(%arg0: i32) -> (i32, i32, i32) {
    %c0_i32 = arith.constant 0 : i32
    %c0_i32_0 = arith.constant 0 : i32
    %c0_i32_1 = arith.constant 0 : i32
    return %arg0, %c0_i32, %c0_i32_0 : i32, i32, i32
  }
  func.func @transform_5(%arg0: i32) -> (i32, i32) {
    %c0_i32 = arith.constant 0 : i32
    %c0_i32_0 = arith.constant 0 : i32
    %c0_i32_1 = arith.constant 0 : i32
    return %c0_i32, %c0_i32_0 : i32, i32
  }
  func.func @transform_6(%arg0: i32) -> (i32, i32) {
    %c0_i32 = arith.constant 0 : i32
    %c0_i32_0 = arith.constant 0 : i32
    %c0_i32_1 = arith.constant 0 : i32
    return %c0_i32, %c0_i32_0 : i32, i32
  }
  func.func @transform_7(%arg0: i32) -> (i32, i32) {
    %c0_i32 = arith.constant 0 : i32
    %c0_i32_0 = arith.constant 0 : i32
    %c0_i32_1 = arith.constant 0 : i32
    return %c0_i32, %c0_i32_0 : i32, i32
  }
  func.func @transform_8(%arg0: i32) -> (i32, i32) {
    %c0_i32 = arith.constant 0 : i32
    %c0_i32_0 = arith.constant 0 : i32
    %c0_i32_1 = arith.constant 0 : i32
    return %c0_i32, %c0_i32_0 : i32, i32
  }
  func.func @transform_9(%arg0: i32) -> (i32, i32, i32) {
    %c0_i32 = arith.constant 0 : i32
    %c0_i32_0 = arith.constant 0 : i32
    %c0_i32_1 = arith.constant 0 : i32
    return %arg0, %c0_i32, %c0_i32_0 : i32, i32, i32
  }
  func.func @transform_10(%arg0: i32) -> (i32, i32, i32) {
    %c0_i32 = arith.constant 0 : i32
    %c0_i32_0 = arith.constant 0 : i32
    %c0_i32_1 = arith.constant 0 : i32
    return %arg0, %c0_i32, %c0_i32_0 : i32, i32, i32
  }
}

</mosaic_0001>

<bundles_post_ra>
// kernel: tpu_custom_call.1
= control target key start
LH: loop header
LB: loop body
LE: loop exit
PB: predicated region body
PF: predicated region fallthrough
CT: control target
= control target key end

     0   :  { %17 = vsyncpa [#allocation4], 0  ;;  %s1727_s0 = inlined_call_operand.<no memory space> [shape: f32[1,1], index: 0, kind: input, shape index: {}]   ;;  %s1728_s1 = inlined_call_operand.hbm [shape: f32[2,4,256], index: 1, kind: input, shape index: {}]   ;;  %s1729_s2 = inlined_call_operand.hbm [shape: f32[2,4,256], index: 2, kind: input, shape index: {}]   ;;  %s1730_s3 = inlined_call_operand.vmem [shape: f32[2,1,256], index: 3, kind: input, shape index: {}]   ;;  %s1731_s4 = inlined_call_operand.vmem [shape: f32[2,1,32], index: 4, kind: input, shape index: {}]   ;;  %s1732_s5 = inlined_call_operand.hbm [shape: f32[32,72], index: 5, kind: input, shape index: {}]   ;;  %s1733_s6 = inlined_call_operand.vmem [shape: f32[1,72], index: 6, kind: input, shape index: {}]   ;;  %s1734_s7 = inlined_call_operand.vmem [shape: f32[8,72], index: 7, kind: input, shape index: {}]   ;;  %s1735_s8 = inlined_call_operand.vmem [shape: f32[1,8], index: 8, kind: input, shape index: {}]   ;;  %s1736_s9 = inlined_call_operand.hbm [shape: f32[2,8,256], index: 9, kind: output, shape index: {0}]   ;;  %s1737_s10 = inlined_call_operand.hbm [shape: f32[2,1,256], index: 10, kind: output, shape index: {1}]  }
   0x1   :  { %18 = vsyncpa [#allocation7], 0 }
   0x2   :  { %19 = vsyncpa [#allocation5], 0 }
   0x3   :  { %20 = vsyncpa [#allocation11], 0  ;;  %s1195_s13 = smov [#allocation6]   ;;  %s1196_s15 = smov [#allocation3]  }
   0x4   :  { %s40_s14 = sshll.u32 %s1195_s13, 4  ;;  %s28_s16 = sshll.u32 %s1196_s15, 4  ;;  %s41_s14 = int_to_ptr.vmem [resolvable:$true] %s40_s14  ;;  %s1274_s16 = int_to_ptr.vmem [resolvable:$true] %s28_s16 }
   0x5   :  { %s1077_s19 = scalar_lea.hbm %s1729_s2, 256 }
   0x6   :  { %p1078_p0 = scmp.ne.s32.totalorder %s1729_s2, %s1077_s19  ;;  %p1081_p1 = scmp.lt.u32.totalorder %s1077_s19, %s1729_s2 }
   0x8   :  { %p1083_p2 = pnand %p1081_p1, %p1078_p0 }
   0xa   :  { %1086 = shalt.err (!%p1083_p2)
}
   0xb   :  { %s1087_s24 = scalar_lea.vmem %s41_s14, 256  ;;  %p1092_p4 = scmp.lt.s32.totalorder %s41_s14, %s41_s14 }
   0xc   :  { %p1088_p3 = scmp.ne.s32.totalorder %s41_s14, %s1087_s24  ;;  %p1093_p5 = scmp.lt.s32.totalorder %s1087_s24, %s1087_s24 }
   0xe   :  { %p1094_p6 = por %p1093_p5, %p1092_p4 }
  0x10   :  { %p1095_p7 = pnand %p1094_p6, %p1088_p3 }
  0x12   :  { %1098 = shalt.err (!%p1095_p7)
}
  0x13   :  { %s1197_s25 = smov 128   ;;  %s1198_s26 = smov 8  }
  0x14   :  { %46 = dma.hbm_to_vmem [thread:$0]  %s1729_s2, 256, %s41_s14, [#allocation7], %s1197_s25, %s1197_s25, %s1198_s26  }
  0x15   :  { %s1099_s11 = scalar_lea.hbm %s1728_s1, 256 }
  0x16   :  { %p1100_p8 = scmp.ne.s32.totalorder %s1728_s1, %s1099_s11  ;;  %p1103_p9 = scmp.lt.u32.totalorder %s1099_s11, %s1728_s1 }
  0x18   :  { %p1105_p10 = pnand %p1103_p9, %p1100_p8 }
  0x1a   :  { %1108 = shalt.err (!%p1105_p10)
}
  0x1b   :  { %s1109_s18 = scalar_lea.vmem %s1274_s16, 256  ;;  %p1114_p12 = scmp.lt.s32.totalorder %s1274_s16, %s1274_s16 }
  0x1c   :  { %p1110_p11 = scmp.ne.s32.totalorder %s1274_s16, %s1109_s18  ;;  %p1115_p13 = scmp.lt.s32.totalorder %s1109_s18, %s1109_s18 }
  0x1e   :  { %p1116_p0 = por %p1115_p13, %p1114_p12 }
  0x20   :  { %p1117_p1 = pnand %p1116_p0, %p1110_p11 }
  0x22   :  { %1120 = shalt.err (!%p1117_p1)
}
  0x23   :  { %34 = dma.hbm_to_vmem [thread:$0]  %s1728_s1, 256, %s1274_s16, [#allocation4], %s1197_s25, %s1197_s25, %s1198_s26  }
  0x24   :  { %s1199_s19 = smov [#allocation8]   ;;  %s1121_s23 = scalar_lea.hbm %s1732_s5, 512 }
  0x25   :  { %s56_s20 = sshll.u32 %s1199_s19, 4  ;;  %p1122_p2 = scmp.ne.s32.totalorder %s1732_s5, %s1121_s23  ;;  %s57_s20 = int_to_ptr.vmem [resolvable:$true] %s56_s20 }
  0x26   :  { %p1125_p3 = scmp.lt.u32.totalorder %s1121_s23, %s1732_s5 }
  0x28   :  { %p1127_p4 = pnand %p1125_p3, %p1122_p2 }
  0x2a   :  { %1130 = shalt.err (!%p1127_p4)
}
  0x2b   :  { %s1131_s30 = scalar_lea.vmem %s57_s20, 512  ;;  %p1136_p6 = scmp.lt.s32.totalorder %s57_s20, %s57_s20 }
  0x2c   :  { %p1132_p5 = scmp.ne.s32.totalorder %s57_s20, %s1131_s30  ;;  %p1137_p7 = scmp.lt.s32.totalorder %s1131_s30, %s1131_s30 }
  0x2e   :  { %p1138_p8 = por %p1137_p7, %p1136_p6 }
  0x30   :  { %p1139_p9 = pnand %p1138_p8, %p1132_p5 }
  0x32   :  { %1142 = shalt.err (!%p1139_p9)
}
  0x33   :  { %62 = dma.hbm_to_vmem [thread:$0]  %s1732_s5, 512, %s57_s20, [#allocation7], %s1197_s25, %s1197_s25, %s1198_s26  }
  0x34   :  { %1187 = dma.done.wait [#allocation4], 256  }
  0x35   :  { %1188 = vsyncadd [#allocation4], 4294967040 }
  0x36   :  { %1189 = dma.done.wait [#allocation7], 768  }
  0x37   :  { %1190 = vsyncadd [#allocation7], 4294966528  ;;  %v80_v0 = vlaneseq  ;;  %v1200_v1 = vmov 0.0|0.0   ;;  %vm1743_vm0 = vmmov 0   ;;  %v1202_v2 = vmov 0.0   ;;  %v117_v7 = vld [vmem:[#allocation8] sm:$0xff] }
  0x38   :  { %959 = vmatprep.subr.bf16.mxu0 %v1200_v1  ;;  %946 = vmatprep.mubr.msk.f32.mxu0 %vm1743_vm0, %v1202_v2  ;;  %v1203_v3 = vmov 1966171168   ;;  %v118_v8 = vld [vmem:[#allocation8 + $0x8] sm:$0xff]  ;;  %v119_v9 = vld [vmem:[#allocation8 + $0x10] sm:$0xff]  ;;  %v120_v12 = vld [vmem:[#allocation8 + $0x18] sm:$0xff]  ;;  %v239_v19 = vstv %s1727_s0  ;;  %vm145_vm1 = vcmask 261120  }
  0x39   :  { %v132_v4 = vunpack.c.l.s4 %v1203_v3  ;;  %949 = vmatprep.subr.mxu1 %v1202_v2  ;;  %951 = vmatprep.mubr.msk.f32.mxu1 %vm1743_vm0, %v1202_v2  ;;  %v135_v5 = vshrl.u32 %v80_v0, 7  ;;  %v960_v11 = vpack.c.bf16 %v118_v8, %v117_v7  ;;  %v115_v13 = vld [vmem:[%s1731_s4] sm:$0x1]  ;;  %v116_v14 = vld [vmem:[%s1731_s4 + $0x1] sm:$0x1]  ;;  %v241_v20 = vld [vmem:[#allocation6] sm:$0xff]  ;;  %v963_v21 = vpack.c.bf16 %v120_v12, %v119_v9 }
  0x3a   :  { %v130_v15 = vcombine.low %v115_v13, %v116_v14  ;;  %v220_v17 = vld [vmem:[%s1730_s3] sm:$0x3]  ;;  %v254_v29 = vcombine.high %v241_v20, %v241_v20  ;;  %vm1750_vm2 = vcmask 1043456   ;;  %s1204_s2 = smov 16   ;;  %vm1745_vm3 = vcmask 588800   ;;  %s1207_s22 = smov 15  }
  0x3b   :  { %v133_v6 = vunpack.c.0.s8 %v132_v4  ;;  %v1340_v16 = vsub.s32 0, %v135_v5  ;;  %v221_v18 = vld [vmem:[#allocation3] sm:$0xff]  ;;  %961 = vmatpush3.bf16.msra.mxu0 %v960_v11  ;;  %v1348_v22 = vsub.s32 1, %v135_v5  ;;  %v238_v23 = vsub.f32 1.0, %v220_v17  ;;  %s1208_s23 = smov 1   ;;  %s1209_s24 = smov 127  }
  0x3c   :  { %962 = vmatprep.subr.bf16.mxu0 %v1200_v1  ;;  %v234_v27 = vcombine.high %v221_v18, %v221_v18  ;;  %v872_v42 = vld [vmem:[%s1733_s6] ss:$0 sm:$0xff]  ;;  %s1205_s6 = smov 17   ;;  %s1210_s27 = smov 113   ;;  %v1397_v55 = vand.u32 127, %v80_v0  ;;  %vm1742_vm11 = vcmask 64512  }
  0x3d   :  { %v1332_v10 = vsub.s32 %v133_v6, %v135_v5  ;;  %v1352_v25 = vrot.slane %v220_v17, %v1340_v16  ;;  %v1355_v26 = vrot.slane %v220_v17, %v1348_v22  ;;  %v240_v28 = vmul.f32 %v239_v19, %v238_v23  ;;  %v218_v46 = vld [vmem:[%s1734_s7] sm:$0xff]  ;;  %s1206_s7 = smov 112   ;;  %s1211_s28 = smov 111  }
  0x3e   :  { %v1400_v58 = vadd.s32 128, %v1397_v55  ;;  %v87_v59 = vand.u32 15, %v1397_v55  ;;  %vm1738_vm4 = vcmp.lt.s32.totalorder %v1397_v55, 16  ;;  %vm1739_vm5 = vcmp.lt.s32.totalorder %v1397_v55, 17  ;;  %s1214_s0 = smov [#allocation9]  }
  0x3f   :  { %v137_v24 = vrot.slane %v130_v15, %v1332_v10  ;;  %964 = vmatpush3.bf16.msra.mxu0 %v963_v21  ;;  %v246_v31 = vrot.slane %v240_v28, %v1340_v16  ;;  %v250_v32 = vrot.slane %v240_v28, %v1348_v22  ;;  %v236_v33 = vmul.f32 %v1352_v25, %v221_v18 }
  0x40   :  { %v237_v34 = vmul.f32 %v234_v27, %v1355_v26  ;;  %v94_v4 = vand.u32 15, %v1400_v58  ;;  %vm1406_vm6 = vcmp.ge.s32.totalorder %v87_v59, 1  ;;  %vm111_vm7 = vcmp.ge.s32.totalorder %v1397_v55, 16 }
  0x41   :  { %v144_v30 = vrot.slane %v137_v24, %v1332_v10  ;;  %v256_v35 = vmul.f32 %v246_v31, %v241_v20  ;;  %v257_v36 = vmul.f32 %v254_v29, %v250_v32  ;;  %vm361_vm8 = vmand %vm111_vm7, %vm1406_vm6  ;;  %vm1740_vm10 = vcmp.lt.s32.totalorder %v1397_v55, 15  ;;  %v1450_v29 = vld [vmem:[%s1735_s8] sm:$0x1] }
  0x42   :  { %vm1425_vm9 = vcmp.ge.s32.totalorder %v94_v4, 1  ;;  %vm1430_vm12 = vcmp.lt.s32.totalorder %v94_v4, 15  ;;  %vm1436_vm13 = vmpackc.low %vm111_vm7, %vm361_vm8  ;;  %vm1741_vm14 = vcmp.lt.s32.totalorder %v1397_v55, 1  ;;  %vm1441_vm15 = vcmp.lt.s32.totalorder %v87_v59, 15 }
  0x43   :  { %947 = vmatmul.mubr.msk.f32.vlgmr.msra.gmra.mrb[0].mxu0 %vm145_vm1, %v144_v30  ;;  %v260_v37 = vrot.slane %v256_v35, 4  ;;  %v261_v38 = vrot.slane %v257_v36, 4  ;;  %v1762_v27 = vmov 0  ;;  %vm1212_vm1 = vmmov 1  }
  0x44   :  { %v1763_v27 = vsel %vm1441_vm15, 4294967295, %v1762_v27  ;;  %vm1455_vm8 = vmpackc.low %vm1212_vm1, %vm1425_vm9 }
  0x45   :  { %v1367_v39 = vsel %vm1750_vm2, %v236_v33, %v260_v37  ;;  %v1370_v40 = vsel %vm1750_vm2, %v237_v34, %v261_v38  ;;  %vm1505_vm0 = vmpackc.low %vm1430_vm12, %vm1212_vm1 }
  0x46   :  { %v994_v41 = vpack.i.bf16 %v1370_v40, %v1367_v39 }
  0x48   :  { %995 = vrot.lane.b32.xlu1 %v994_v41, %s1204_s2 }
  0xba   :  { %v996_v60 = vpop.permute.xlu1 %995 }
  0xbb   :  { %v998_v61 = vunpack.i.h.bf16 %v996_v60  ;;  %v997_v62 = vunpack.i.l.bf16 %v996_v60 }
  0xbd   :  { %v374_v6 = vsel %vm1738_vm4, %v997_v62, %v998_v61  ;;  %v375_v7 = vsel %vm1738_vm4, %v998_v61, %v997_v62  ;;  %vm1744_vm4 = vmpackc.low %vm1425_vm9, %vm1430_vm12 }
 0x116   :  { %v214_v43 = vpop.f32.mrb[0].mxu0 }
 0x117   :  { %v215_v44 = vadd.f32 %v872_v42, %v214_v43  ;;  %v948_v45 = vpop.f32.mrb[1].mxu0 }
 0x119   :  { %v270_v47 = vrot.slane %v215_v44, %v1340_v16  ;;  %v607_v48 = vrot.slane %v215_v44, %v1348_v22 }
 0x11b   :  { %v1383_v49 = vmul.f32 %v607_v48, %v218_v46  ;;  %v271_v50 = vmul.f32 %v270_v47, %v218_v46 }
 0x11d   :  { %v609_v51 = vmul.f32 %v1383_v49, %v1383_v49  ;;  %v272_v52 = vmul.f32 %v271_v50, %v271_v50 }
 0x11f   :  { %v610_v53 = vsel %vm1745_vm3, %v609_v51, 0.0  ;;  %v274_v54 = vsel %vm1745_vm3, %v272_v52, 0.0 }
 0x120   :  { %611 = vadd.xlane.f32.xlu1 %v610_v53  ;;  %275 = vadd.xlane.f32.xlu0 %v274_v54 }
 0x131   :  { %1020 = vrot.lane.b32.xlu1 %v994_v41, %s1206_s7 }
 0x136   :  { %990 = vrot.lane.b32.xlu0 %v994_v41, %s1205_s6 }
 0x13a   :  { %1000 = vrot.lane.b32.xlu0 %v994_v41, %s1207_s22 }
 0x13e   :  { %1005 = vrot.lane.b32.xlu0 %v994_v41, %s1208_s23 }
 0x142   :  { %1010 = vrot.lane.b32.xlu0 %v994_v41, %s1209_s24 }
 0x146   :  { %1015 = vrot.lane.b32.xlu0 %v994_v41, %s1210_s27 }
 0x14a   :  { %1025 = vrot.lane.b32.xlu0 %v994_v41, %s1211_s28 }
 0x1ad   :  { %v276_v56 = vpop.xlane.xlu0 %275  ;;  %v1415_v9 = vpop.xlane.xlu1 %611 }
 0x1ae   :  { %v277_v57 = vadd.f32 1e-08, %v276_v56 }
 0x1b0   :  { %1073 = vrsqrt.f32 %v277_v57 }
 0x1b1   :  { %v991_v63 = vpop.permute.xlu0 %990  ;;  %v1021_v34 = vpop.permute.xlu1 %1020 }
 0x1b2   :  { %v993_v1 = vunpack.i.h.bf16 %v991_v63  ;;  %v992_v3 = vunpack.i.l.bf16 %v991_v63  ;;  %v1023_v43 = vunpack.i.h.bf16 %v1021_v34  ;;  %v1022_v47 = vunpack.i.l.bf16 %v1021_v34 }
 0x1b4   :  { %v359_v11 = vsel %vm1739_vm5, %v992_v3, %v993_v1  ;;  %v360_v12 = vsel %vm1739_vm5, %v993_v1, %v992_v3  ;;  %vm1476_vm5 = vmand %vm111_vm7, %vm1441_vm15 }
 0x1b5   :  { %v1001_v8 = vpop.permute.xlu0 %1000  ;;  %v876_v20 = vpack.c.bf16 %v374_v6, %v359_v11  ;;  %v879_v21 = vpack.c.bf16 %v375_v7, %v360_v12  ;;  %vm1747_vm7 = vmpackc.low %vm1406_vm6, %vm1476_vm5 }
 0x1b6   :  { %v1003_v13 = vunpack.i.h.bf16 %v1001_v8  ;;  %v1002_v14 = vunpack.i.l.bf16 %v1001_v8  ;;  %v1776_v8 = vmov 0 }
 0x1b8   :  { %v387_v31 = vsel %vm1740_vm10, %v1002_v14, %v1003_v13  ;;  %v388_v35 = vsel %vm1740_vm10, %v1003_v13, %v1002_v14  ;;  %vm1746_vm10 = vcmp.lt.s32.totalorder %v1397_v55, 127 }
 0x1b9   :  { %v1006_v24 = vpop.permute.xlu0 %1005 }
 0x1ba   :  { %v1074_v18 = vpop.eup %1073  ;;  %v1008_v32 = vunpack.i.h.bf16 %v1006_v24  ;;  %v1007_v33 = vunpack.i.l.bf16 %v1006_v24  ;;  %v1213_v24 = vmov 0  }
 0x1bb   :  { %v1445_v28 = vmul.f32 %v1074_v18, %v271_v50  ;;  %802 = vmatprep.mubr.bf16.mxu0 %v1213_v24 }
 0x1bc   :  { %v402_v36 = vsel %vm1741_vm14, %v1007_v33, %v1008_v32  ;;  %v403_v37 = vsel %vm1741_vm14, %v1008_v32, %v1007_v33  ;;  %vm114_vm14 = vcmp.lt.s32.totalorder %v1400_v58, 240  ;;  %v559_v33 = vld [vmem:[#allocation3 + $0x8] sm:$0xff] }
 0x1bd   :  { %950 = vmatpush3.msra.mxu1 %v1445_v28  ;;  %v882_v41 = vpack.c.bf16 %v402_v36, %v387_v31  ;;  %v1011_v42 = vpop.permute.xlu0 %1010  ;;  %v885_v44 = vpack.c.bf16 %v403_v37, %v388_v35  ;;  %vm431_vm3 = vmand %vm114_vm14, %vm1425_vm9  ;;  %v579_v36 = vld [vmem:[#allocation6 + $0x8] sm:$0xff] }
 0x1be   :  { %952 = vmatmul.mubr.msk.f32.vlgmr.msra.gmra.mrb[0].mxu1 %vm1742_vm11, %v1450_v29  ;;  %877 = vmatprep.subr.msk.bf16.mxu1 %vm1455_vm8, %v876_v20  ;;  %v1013_v45 = vunpack.i.h.bf16 %v1011_v42  ;;  %v1012_v46 = vunpack.i.l.bf16 %v1011_v42  ;;  %vm1748_vm11 = vcmp.lt.s32.totalorder %v1397_v55, 112  ;;  %v572_v42 = vcombine.high %v559_v33, %v559_v33 }
 0x1bf   :  { %880 = vmatpush1.bf16.msk.msra.mxu1 %vm1436_vm13, %v879_v21  ;;  %v444_v56 = vsel %vm1748_vm11, %v1023_v43, %v1022_v47  ;;  %v443_v59 = vsel %vm1748_vm11, %v1022_v47, %v1023_v43  ;;  %vm1751_vm11 = vcmp.lt.s32.totalorder %v1397_v55, 111  ;;  %v901_v21 = vld [vmem:[%s1730_s3 + $0x2] sm:$0x3]  ;;  %518 = vmatprep.mubr.bf16.mxu1 %v1213_v24  ;;  %v592_v43 = vcombine.high %v579_v36, %v579_v36  ;;  %s843_s3 = sshll.u32 %s1214_s0, 4  ;;  %s844_s3 = int_to_ptr.vmem [resolvable:$true] %s843_s3 }
 0x1c0   :  { %883 = vmatprep.subr.msk.bf16.mxu1 %vm1744_vm4, %v882_v41  ;;  %v415_v48 = vsel %vm1746_vm10, %v1012_v46, %v1013_v45  ;;  %v416_v50 = vsel %vm1746_vm10, %v1013_v45, %v1012_v46  ;;  %vm1749_vm4 = vcmp.lt.s32.totalorder %v1397_v55, 113  ;;  %vm1530_vm10 = vmpackc.low %vm1441_vm15, %vm1212_vm1  ;;  %v576_v31 = vsub.f32 1.0, %v901_v21  ;;  %s1143_s25 = scalar_lea.vmem %s844_s3, 512  ;;  %p1148_p11 = scmp.lt.s32.totalorder %s844_s3, %s844_s3 }
 0x1c1   :  { %v888_v52 = vpack.c.bf16 %v416_v50, %v1370_v40  ;;  %v1016_v53 = vpop.permute.xlu0 %1015  ;;  %v891_v54 = vpack.c.bf16 %v415_v48, %v1367_v39  ;;  %v1585_v34 = vrot.slane %v901_v21, %v1340_v16  ;;  %v1588_v35 = vrot.slane %v901_v21, %v1348_v22  ;;  %p1144_p10 = scmp.ne.s32.totalorder %s844_s3, %s1143_s25  ;;  %p1149_p12 = scmp.lt.s32.totalorder %s1143_s25, %s1143_s25 }
 0x1c2   :  { %v1018_v40 = vunpack.i.h.bf16 %v1016_v53  ;;  %v1017_v57 = vunpack.i.l.bf16 %v1016_v53  ;;  %v577_v32 = vmul.f32 %v576_v31, %v239_v19 }
 0x1c3   :  { %886 = vmatpush1.bf16.msk.msra.mxu1 %vm1747_vm7, %v885_v44  ;;  %vm1540_vm7 = vmpackc.low %vm114_vm14, %vm431_vm3  ;;  %v574_v44 = vmul.f32 %v1585_v34, %v559_v33  ;;  %v575_v46 = vmul.f32 %v572_v42, %v1588_v35  ;;  %p1150_p13 = por %p1149_p12, %p1148_p11 }
 0x1c4   :  { %889 = vmatprep.subr.msk.bf16.mxu1 %vm1505_vm0, %v888_v52  ;;  %v428_v39 = vsel %vm1749_vm4, %v1017_v57, %v1018_v40  ;;  %v429_v61 = vsel %vm1749_vm4, %v1018_v40, %v1017_v57  ;;  %vm1551_vm4 = vmand %vm114_vm14, %vm1430_vm12  ;;  %v584_v37 = vrot.slane %v577_v32, %v1340_v16  ;;  %v588_v41 = vrot.slane %v577_v32, %v1348_v22 }
 0x1c5   :  { %v894_v63 = vpack.c.bf16 %v444_v56, %v429_v61  ;;  %v1026_v1 = vpop.permute.xlu0 %1025  ;;  %v897_v3 = vpack.c.bf16 %v443_v59, %v428_v39  ;;  %vm1560_vm3 = vmpackc.low %vm1212_vm1, %vm1406_vm6  ;;  %v613_v22 = vadd.f32 1e-08, %v1415_v9  ;;  %vm1778_vm14 = vcmask 588800   ;;  %p1151_p0 = pnand %p1150_p13, %p1144_p10 }
 0x1c6   :  { %v1028_v4 = vunpack.i.h.bf16 %v1026_v1  ;;  %v1027_v6 = vunpack.i.l.bf16 %v1026_v1  ;;  %v1777_v8 = vsel %vm1560_vm3, 4294967295, %v1776_v8  ;;  %v594_v45 = vmul.f32 %v584_v37, %v579_v36 }
 0x1c7   :  { %892 = vmatpush1.bf16.msk.msra.mxu1 %vm1530_vm10, %v891_v54  ;;  %v595_v19 = vmul.f32 %v592_v43, %v588_v41  ;;  %1075 = vrsqrt.f32 %v613_v22  ;;  %vm1779_vm1 = vmmov 0  }
 0x1c8   :  { %895 = vmatprep.subr.msk.bf16.mxu1 %vm1540_vm7, %v894_v63  ;;  %v456_v11 = vsel %vm1751_vm11, %v1027_v6, %v1028_v4  ;;  %v457_v58 = vsel %vm1751_vm11, %v1028_v4, %v1027_v6  ;;  %v598_v47 = vrot.slane %v594_v45, 4  ;;  %vm1781_vm11 = vcmp.lt.s32.totalorder %v1397_v55, 17 }
 0x1c9   :  { %v465_v12 = vsel %vm1551_vm4, %v457_v58, 0.0  ;;  %v464_v13 = vsel %vm1441_vm15, %v456_v11, 0.0  ;;  %v599_v48 = vrot.slane %v595_v19, 4 }
 0x1ca   :  { %v476_v14 = vpack.c.bf16 %v465_v12, %v465_v12  ;;  %v475_v18 = vpack.c.bf16 %v464_v13, %v464_v13  ;;  %v1595_v50 = vsel %vm1750_vm2, %v574_v44, %v598_v47 }
 0x1cb   :  { %898 = vmatpush1.bf16.msk.msra.mxu1 %vm1560_vm3, %v897_v3  ;;  %v1598_v52 = vsel %vm1750_vm2, %v575_v46, %v599_v48 }
 0x1cc   :  { %899 = vmatprep.subr.msk.bf16.mxu1 %vm1750_vm2, %v476_v14  ;;  %v481_v20 = vsel %vm1750_vm2, %v475_v18, 0  ;;  %v1029_v16 = vpack.i.bf16 %v1598_v52, %v1595_v50  ;;  %vm1780_vm2 = vcmask 64512  }
 0x1ce   :  { %1030 = vrot.lane.b32.xlu0 %v1029_v16, %s1205_s6  ;;  %1045 = vrot.lane.b32.xlu1 %v1029_v16, %s1208_s23 }
 0x1cf   :  { %495 = vmatpush1.bf16.msra.mxu1 %v481_v20 }
 0x1d0   :  { %954 = vmatprep.subr.mxu1 %v1202_v2 }
 0x1d1   :  { %v1076_v53 = vpop.eup %1075 }
 0x1d2   :  { %1035 = vrot.lane.b32.xlu0 %v1029_v16, %s1204_s2  ;;  %1055 = vrot.lane.b32.xlu1 %v1029_v16, %s1210_s27  ;;  %v1613_v57 = vmul.f32 %v1076_v53, %v1383_v49 }
 0x1d6   :  { %1040 = vrot.lane.b32.xlu0 %v1029_v16, %s1207_s22  ;;  %1065 = vrot.lane.b32.xlu1 %v1029_v16, %s1211_s28 }
 0x1da   :  { %1050 = vrot.lane.b32.xlu0 %v1029_v16, %s1209_s24 }
 0x1de   :  { %1060 = vrot.lane.b32.xlu0 %v1029_v16, %s1206_s7 }
 0x240   :  { %v1031_v59 = vpop.permute.xlu0 %1030  ;;  %v1046_v39 = vpop.permute.xlu1 %1045 }
 0x241   :  { %v1033_v61 = vunpack.i.h.bf16 %v1031_v59  ;;  %v1032_v9 = vunpack.i.l.bf16 %v1031_v59  ;;  %v1047_v1 = vunpack.i.l.bf16 %v1046_v39 }
 0x243   :  { %v690_v49 = vsel %vm1781_vm11, %v1032_v9, %v1033_v61 }
 0x244   :  { %v1036_v63 = vpop.permute.xlu0 %1035  ;;  %v1056_v3 = vpop.permute.xlu1 %1055 }
 0x245   :  { %v1038_v6 = vunpack.i.h.bf16 %v1036_v63  ;;  %v1037_v11 = vunpack.i.l.bf16 %v1036_v63  ;;  %v1058_v44 = vunpack.i.h.bf16 %v1056_v3  ;;  %v1057_v45 = vunpack.i.l.bf16 %v1056_v3 }
 0x248   :  { %v1041_v18 = vpop.permute.xlu0 %1040  ;;  %v1066_v20 = vpop.permute.xlu1 %1065 }
 0x249   :  { %v1043_v21 = vunpack.i.h.bf16 %v1041_v18  ;;  %v1042_v24 = vunpack.i.l.bf16 %v1041_v18  ;;  %v1068_v31 = vunpack.i.h.bf16 %v1066_v20  ;;  %v1067_v32 = vunpack.i.l.bf16 %v1066_v20 }
 0x24c   :  { %v1051_v43 = vpop.permute.xlu0 %1050 }
 0x24d   :  { %v1053_v46 = vunpack.i.h.bf16 %v1051_v43  ;;  %v1052_v30 = vunpack.i.l.bf16 %v1051_v43 }
 0x250   :  { %v1061_v16 = vpop.permute.xlu0 %1060 }
 0x251   :  { %v1063_v53 = vunpack.i.h.bf16 %v1061_v16 }
 0x291   :  { %v350_v54 = vpop.f32.mrb[0].mxu1 }
 0x292   :  { %v466_v56 = vpack.c.bf16 %v350_v54, %v1445_v28  ;;  %v953_v40 = vpop.f32.mrb[1].mxu1  ;;  %v1048_v28 = vunpack.i.h.bf16 %v1046_v39  ;;  %v1062_v54 = vunpack.i.l.bf16 %v1061_v16 }
 0x294   :  { %900 = vmatmul.mubr.msk.bf16.vlgmr.msra.gmra.mrb[4].mxu1 %vm1778_vm14, %v466_v56  ;;  %vm1782_vm14 = vmmov %vm1781_vm11  ;;  %vm1787_vm11 = vcmp.lt.s32.totalorder %v1397_v55, 15 }
 0x295   :  { %955 = vmatpush3.msra.mxu1 %v1613_v57  ;;  %956 = vmatprep.mubr.msk.f32.mxu1 %vm1779_vm1, %v1202_v2  ;;  %v691_v4 = vsel %vm1782_vm14, %v1033_v61, %v1032_v9  ;;  %vm1783_vm1 = vcmp.lt.s32.totalorder %v1397_v55, 16  ;;  %v706_v33 = vsel %vm1787_vm11, %v1042_v24, %v1043_v21 }
 0x296   :  { %v698_v2 = vsel %vm1783_vm1, %v1037_v11, %v1038_v6  ;;  %vm1784_vm15 = vmmov %vm1783_vm1 }
 0x297   :  { %v699_v58 = vsel %vm1784_vm15, %v1038_v6, %v1037_v11  ;;  %v904_v12 = vpack.c.bf16 %v698_v2, %v690_v49  ;;  %vm1788_vm15 = vmmov %vm1787_vm11  ;;  %vm1800_vm11 = vcmask 1043456  }
 0x298   :  { %v707_v36 = vsel %vm1788_vm15, %v1043_v21, %v1042_v24  ;;  %vm1802_vm15 = vmmov %vm1800_vm11 }
 0x299   :  { %905 = vmatprep.subr.msk.bf16.mxu0 %vm1455_vm8, %v904_v12  ;;  %vm1790_vm8 = vmpackc.low %vm1425_vm9, %vm1430_vm12  ;;  %vm1795_vm9 = vcmp.lt.s32.totalorder %v1397_v55, 113 }
 0x29a   :  { %v730_v48 = vsel %vm1795_vm9, %v1057_v45, %v1058_v44  ;;  %vm1796_vm12 = vmmov %vm1795_vm9 }
 0x29b   :  { %v731_v22 = vsel %vm1796_vm12, %v1058_v44, %v1057_v45 }
 0x29c   :  { %957 = vmatmul.mubr.msk.f32.vlgmr.msra.gmra.mrb[2].mxu1 %vm1780_vm2, %v1450_v29  ;;  %v907_v29 = vpack.c.bf16 %v699_v58, %v691_v4  ;;  %vm1785_vm2 = vcmp.lt.s32.totalorder %v1397_v55, 1 }
 0x29d   :  { %v714_v13 = vsel %vm1785_vm2, %v1047_v1, %v1048_v28  ;;  %vm1786_vm3 = vmmov %vm1785_vm2 }
 0x29e   :  { %v715_v14 = vsel %vm1786_vm3, %v1048_v28, %v1047_v1  ;;  %908 = vmatpush1.bf16.msk.msra.mxu0 %vm1436_vm13, %v907_v29  ;;  %vm1789_vm3 = vcmp.lt.s32.totalorder %v1397_v55, 111  ;;  %v910_v41 = vpack.c.bf16 %v714_v13, %v706_v33  ;;  %vm1792_vm13 = vcmp.lt.s32.totalorder %v1397_v55, 127  ;;  %vm1794_vm2 = vmpackc.low %vm1406_vm6, %vm1476_vm5 }
 0x29f   :  { %v746_v37 = vsel %vm1789_vm3, %v1067_v32, %v1068_v31  ;;  %v913_v42 = vpack.c.bf16 %v715_v14, %v707_v36  ;;  %vm1791_vm14 = vmmov %vm1789_vm3  ;;  %v722_v19 = vsel %vm1792_vm13, %v1052_v30, %v1053_v46  ;;  %vm1797_vm5 = vcmp.lt.s32.totalorder %v1397_v55, 112 }
 0x2a0   :  { %911 = vmatprep.subr.msk.bf16.mxu0 %vm1790_vm8, %v910_v41  ;;  %v747_v23 = vsel %vm1791_vm14, %v1068_v31, %v1067_v32  ;;  %vm1793_vm1 = vmmov %vm1792_vm13  ;;  %v919_v17 = vpack.c.bf16 %v722_v19, %v1595_v50  ;;  %v738_v38 = vsel %vm1797_vm5, %v1062_v54, %v1063_v53 }
 0x2a1   :  { %v723_v47 = vsel %vm1793_vm1, %v1053_v46, %v1052_v30  ;;  %v749_v5 = vsel %vm1551_vm4, %v747_v23, 0.0  ;;  %vm1798_vm6 = vmmov %vm1797_vm5  ;;  %v925_v56 = vpack.c.bf16 %v738_v38, %v730_v48  ;;  %vm1799_vm4 = vnez %v1777_v8 }
 0x2a2   :  { %914 = vmatpush1.bf16.msk.msra.mxu0 %vm1794_vm2, %v913_v42  ;;  %v916_v15 = vpack.c.bf16 %v723_v47, %v1598_v52  ;;  %v739_v50 = vsel %vm1798_vm6, %v1063_v53, %v1062_v54  ;;  %v760_v40 = vpack.c.bf16 %v749_v5, %v749_v5 }
 0x2a3   :  { %v922_v52 = vpack.c.bf16 %v739_v50, %v731_v22 }
 0x2a4   :  { %917 = vmatprep.subr.msk.bf16.mxu0 %vm1505_vm0, %v916_v15  ;;  %vm1801_vm0 = vnez %v1763_v27 }
 0x2a5   :  { %v748_v51 = vsel %vm1801_vm0, %v746_v37, 0.0 }
 0x2a6   :  { %920 = vmatpush1.bf16.msk.msra.mxu0 %vm1530_vm10, %v919_v17  ;;  %v759_v7 = vpack.c.bf16 %v748_v51, %v748_v51  ;;  %vm1688_vm10 = vcmp.lt.s32.totalorder %v80_v0, 256 }
 0x2a7   :  { %923 = vmatprep.subr.msk.bf16.mxu0 %vm1540_vm7, %v922_v52  ;;  %vm1805_vm7 = vcmask 588800  }
 0x2a8   :  { %v765_v55 = vsel %vm1802_vm15, %v759_v7, 0 }
 0x2aa   :  { %926 = vmatpush1.bf16.msk.msra.mxu0 %vm1799_vm4, %v925_v56 }
 0x2ab   :  { %927 = vmatprep.subr.msk.bf16.mxu0 %vm1800_vm11, %v760_v40 }
 0x2ae   :  { %779 = vmatpush1.bf16.msra.mxu0 %v765_v55 }
 0x367   :  { %v520_v60 = vpop.f32.mrb[4].mxu1 }
 0x368   :  { %529 = vst [vmem:[#allocation9] sm:$0xff] %v520_v60  ;;  %v522_v59 = vpop.f32.mrb[5].mxu1 }
 0x369   :  { %530 = vst [vmem:[#allocation9 + $0x8] sm:$0xff] %v522_v59  ;;  %v524_v39 = vpop.f32.mrb[6].mxu1 }
 0x36a   :  { %v531_v62 = vadd.f32 %v524_v39, %v1352_v25  ;;  %v526_v61 = vpop.f32.mrb[7].mxu1 }
 0x36b   :  { %v532_v8 = vadd.f32 %v526_v61, %v1355_v26 }
 0x36d   :  { %v535_v9 = vcombine.low %v531_v62, %v532_v8 }
 0x36f   :  { %v542_v63 = vrot.slane %v535_v9, %v1332_v10  ;;  %v682_v28 = vpop.f32.mrb[2].mxu1 }
 0x370   :  { %v750_v27 = vpack.c.bf16 %v682_v28, %v1613_v57  ;;  %v958_v1 = vpop.f32.mrb[3].mxu1 }
 0x371   :  { %v549_v49 = vrot.slane %v542_v63, %v1332_v10 }
 0x372   :  { %928 = vmatmul.mubr.msk.bf16.vlgmr.msra.gmra.mrb[4].mxu0 %vm1805_vm7, %v750_v27 }
 0x373   :  { %555 = vst.msk [vmem:[#allocation10] sm:$0x3] %vm1688_vm10, %v549_v49 }
 0x445   :  { %v804_v25 = vpop.f32.mrb[4].mxu0 }
 0x446   :  { %814 = vst [vmem:[#allocation9 + $0x10] sm:$0xff] %v804_v25  ;;  %v806_v26 = vpop.f32.mrb[5].mxu0 }
 0x447   :  { %815 = vst [vmem:[#allocation9 + $0x18] sm:$0xff] %v806_v26  ;;  %v808_v57 = vpop.f32.mrb[6].mxu0 }
 0x448   :  { %v816_v0 = vadd.f32 %v808_v57, %v1585_v34  ;;  %v810_v4 = vpop.f32.mrb[7].mxu0 }
 0x449   :  { %1154 = shalt.err (!%p1151_p0)
}
 0x44a   :  { %s1155_s12 = scalar_lea.hbm %s1736_s9, 512 }
 0x44b   :  { %p1156_p1 = scmp.ne.s32.totalorder %s1736_s9, %s1155_s12  ;;  %p1159_p2 = scmp.lt.u32.totalorder %s1155_s12, %s1736_s9 }
 0x44d   :  { %p1161_p3 = pnand %p1159_p2, %p1156_p1 }
 0x44f   :  { %1164 = shalt.err (!%p1161_p3)
}
 0x450   :  { %s1215_s18 = smov 256   ;;  %v817_v34 = vadd.f32 %v810_v4, %v1588_v35  ;;  %s1216_s20 = smov [#allocation10]  }
 0x451   :  { %849 = dma.vmem_to_hbm [thread:$0]  %s844_s3, 512, %s1736_s9, [#allocation5], %s1215_s18, %s1215_s18, %s1204_s2  }
 0x452   :  { %v820_v6 = vcombine.low %v816_v0, %v817_v34  ;;  %s855_s21 = sshll.u32 %s1216_s20, 4  ;;  %s856_s21 = int_to_ptr.vmem [resolvable:$true] %s855_s21 }
 0x453   :  { %s1165_s6 = scalar_lea.vmem %s856_s21, 64  ;;  %p1170_p5 = scmp.lt.s32.totalorder %s856_s21, %s856_s21 }
 0x454   :  { %v827_v11 = vrot.slane %v820_v6, %v1332_v10  ;;  %p1166_p4 = scmp.ne.s32.totalorder %s856_s21, %s1165_s6  ;;  %p1171_p6 = scmp.lt.s32.totalorder %s1165_s6, %s1165_s6 }
 0x456   :  { %v834_v2 = vrot.slane %v827_v11, %v1332_v10  ;;  %p1172_p7 = por %p1171_p6, %p1170_p5 }
 0x458   :  { %837 = vst.msk [vmem:[#allocation10 + $0x2] sm:$0x3] %vm1688_vm10, %v834_v2  ;;  %p1173_p8 = pnand %p1172_p7, %p1166_p4 }
 0x45a   :  { %1176 = shalt.err (!%p1173_p8)
}
 0x45b   :  { %s1177_s7 = scalar_lea.hbm %s1737_s10, 64 }
 0x45c   :  { %p1178_p9 = scmp.ne.s32.totalorder %s1737_s10, %s1177_s7  ;;  %p1181_p10 = scmp.lt.u32.totalorder %s1177_s7, %s1737_s10 }
 0x45e   :  { %p1183_p11 = pnand %p1181_p10, %p1178_p9 }
 0x460   :  { %1186 = shalt.err (!%p1183_p11)
}
 0x461   :  { %s1217_s28 = smov 32   ;;  %s1218_s29 = smov 2  }
 0x462   :  { %861 = dma.vmem_to_hbm [thread:$0]  %s856_s21, 64, %s1737_s10, [#allocation11], %s1217_s28, %s1217_s28, %s1218_s29  }
 0x463   :  { %1191 = dma.done.wait [#allocation5], 512  }
 0x464   :  { %1192 = vsyncadd [#allocation5], 4294966784 }
 0x465   :  { %1193 = dma.done.wait [#allocation11], 64  }
 0x466   :  { %1194 = vsyncadd [#allocation11], 4294967232 }
 0x467   :  { %868 = vsyncpa [#allocation4], 1 }
 0x468   :  { %869 = vsyncpa [#allocation7], 1 }
 0x469   :  { %870 = vsyncpa [#allocation5], 1 }
 0x46a   :  { %871 = vsyncpa [#allocation11], 1 }

</bundles_post_ra>
